<compile_context>
chip_gen: v5e
topology: v5e:2x2
jax: 0.10.0
libtpu: 0.0.40
codegen_flags: <defaults>
</compile_context>

<pallas_src>
import functools

import jax
import jax.numpy as jnp
from jax.experimental import pallas as pl
from jax.experimental.pallas import tpu as pltpu


def _neg_pearson_kernel(preds_ref, labels_ref, out_ref,
                        sx_ref, sy_ref, sxy_ref, sx2_ref, sy2_ref,
                        *, n_time):
    t = pl.program_id(1)

    # Zero the per-row accumulators at the first T tile of this B tile.
    @pl.when(t == 0)
    def _init():
        sx_ref[...] = jnp.zeros_like(sx_ref)
        sy_ref[...] = jnp.zeros_like(sy_ref)
        sxy_ref[...] = jnp.zeros_like(sxy_ref)
        sx2_ref[...] = jnp.zeros_like(sx2_ref)
        sy2_ref[...] = jnp.zeros_like(sy2_ref)

    # Load native-dtype tiles and widen in-register (no extra HBM traffic).
    a = preds_ref[...].astype(jnp.float32)   # (TILE_B, TILE_T)
    b = labels_ref[...].astype(jnp.float32)  # (TILE_B, TILE_T)

    sx_ref[...] += jnp.sum(a, axis=1, keepdims=True)
    sy_ref[...] += jnp.sum(b, axis=1, keepdims=True)
    sxy_ref[...] += jnp.sum(a * b, axis=1, keepdims=True)
    sx2_ref[...] += jnp.sum(a * a, axis=1, keepdims=True)
    sy2_ref[...] += jnp.sum(b * b, axis=1, keepdims=True)

    # Finalize at the last T tile: Pearson formula per row, write (1 - r).
    @pl.when(t == pl.num_programs(1) - 1)
    def _finalize():
        # NOTE: the PyTorch module always uses N = preds.shape[1] (full T),
        # even in downsample mode — reproduce that exactly.
        n = jnp.float32(n_time)
        sum_x = sx_ref[...]
        sum_y = sy_ref[...]
        sum_xy = sxy_ref[...]
        sum_x2 = sx2_ref[...]
        sum_y2 = sy2_ref[...]
        num = n * sum_xy - sum_x * sum_y
        var = (n * sum_x2 - sum_x * sum_x) * (n * sum_y2 - sum_y * sum_y)
        pearson = num * jax.lax.rsqrt(var)          # EUP rsqrt + VPU mul
        out_ref[...] = (1.0 - pearson).astype(out_ref.dtype)


def _pick_tile(dim, candidates):
    """Largest candidate that evenly divides `dim`; fall back to `dim`."""
    for c in candidates:
        if c <= dim and dim % c == 0:
            return c
    return dim


def neg_pearson_loss(preds, labels, downsample_mode=0):
    """Negative Pearson loss matching the PyTorch Neg_Pearson module.

    preds: (B, T).  labels: (B, T) for downsample_mode=0, (B, 2*T) for mode 1.
    """
    B, T = preds.shape
    if B == 0:
        return jnp.float32(0.0)

    if downsample_mode == 1:
        # TODO(synk): fold the stride-2 downsample into the kernel's label
        # load (strided in-kernel load) to avoid this extra HBM pass.
        labels = labels[:, ::2]
    assert labels.shape == preds.shape, (labels.shape, preds.shape)

    tile_b = _pick_tile(B, (128, 64, 32, 16, 8))
    tile_t = _pick_tile(T, (2048, 1024, 512, 256, 128))
    grid = (B // tile_b, T // tile_t)

    # Double-buffered footprint of both inputs plus headroom for scratch/out.
    block_bytes = tile_b * tile_t * (preds.dtype.itemsize + labels.dtype.itemsize)
    vmem_limit = int(min(64 * 2**20, max(8 * 2**20, 4 * block_bytes)))

    kernel = functools.partial(_neg_pearson_kernel, n_time=T)

    per_row = pl.pallas_call(
        kernel,
        out_shape=jax.ShapeDtypeStruct((B, 1), jnp.float32),
        grid_spec=pltpu.PrefetchScalarGridSpec(
            num_scalar_prefetch=0,
            grid=grid,
            in_specs=[
                pl.BlockSpec((tile_b, tile_t), lambda i, t: (i, t)),
                pl.BlockSpec((tile_b, tile_t), lambda i, t: (i, t)),
            ],
            out_specs=pl.BlockSpec((tile_b, 1), lambda i, t: (i, 0)),
            scratch_shapes=[pltpu.VMEM((tile_b, 1), jnp.float32)
                            for _ in range(5)],
        ),
        compiler_params=pltpu.CompilerParams(
            dimension_semantics=("parallel", "arbitrary"),
            vmem_limit_bytes=vmem_limit,
        ),
    )(preds, labels)

    # Trivial epilogue: mean of per-row (1 - pearson).
    return jnp.sum(per_row) / jnp.float32(B)


def _reference_neg_pearson(preds, labels, downsample_mode=0):
    # Pure-JAX reference mirroring the torch loop semantics.
    loss = 0.0
    for i in range(preds.shape[0]):
        a = preds[i, :].astype(jnp.float32)
        b = labels[i, :].astype(jnp.float32)
        if downsample_mode == 1:
            b = b[0::2]
        sum_x = jnp.sum(a)
        sum_y = jnp.sum(b)
        sum_xy = jnp.sum(a * b)
        sum_x2 = jnp.sum(a * a)
        sum_y2 = jnp.sum(b * b)
        N = preds.shape[1]
        pearson = (N * sum_xy - sum_x * sum_y) / jnp.sqrt(
            (N * sum_x2 - sum_x * sum_x) * (N * sum_y2 - sum_y * sum_y))
        loss += 1 - pearson
    if preds.shape[0] != 0:
        loss = loss / preds.shape[0]
    return loss


if __name__ == "__main__":
    key = jax.random.PRNGKey(0)
    k1, k2, k3 = jax.random.split(key, 3)

    # B multiple of 8 fills vreg sublanes; T = 1536 exercises 3 reduction tiles.
    B, T = 8, 1536
    preds = jax.random.normal(k1, (B, T), dtype=jnp.float32)
    labels = 0.7 * preds + 0.3 * jax.random.normal(k2, (B, T), dtype=jnp.float32)

    # Mode 0.
    loss0 = neg_pearson_loss(preds, labels, downsample_mode=0)
    jax.block_until_ready(loss0)
    ref0 = _reference_neg_pearson(preds, labels, downsample_mode=0)
    assert jnp.allclose(loss0, ref0, atol=1e-4, rtol=1e-4), (loss0, ref0)

    # Mode 1: labels have 2x the length of preds and are downsampled by 2.
    labels2 = jax.random.normal(k3, (B, 2 * T), dtype=jnp.float32)
    labels2 = labels2.at[:, ::2].set(0.6 * preds + 0.4 * labels2[:, ::2])
    loss1 = neg_pearson_loss(preds, labels2, downsample_mode=1)
    jax.block_until_ready(loss1)
    ref1 = _reference_neg_pearson(preds, labels2, downsample_mode=1)
    assert jnp.allclose(loss1, ref1, atol=1e-4, rtol=1e-4), (loss1, ref1)

    print("KERNEL_OK")
</pallas_src>

<mosaic_0001>
module attributes {stable_mosaic.version = 11 : i64} {
  func.func @_neg_pearson_kernel(%arg0: i32, %arg1: i32, %arg2: memref<8x512xf32, #tpu.memory_space<vmem>>, %arg3: memref<8x512xf32, #tpu.memory_space<vmem>>, %arg4: memref<8x1xf32, #tpu.memory_space<vmem>>, %arg5: memref<8x1xf32, #tpu.memory_space<vmem>>, %arg6: memref<8x1xf32, #tpu.memory_space<vmem>>, %arg7: memref<8x1xf32, #tpu.memory_space<vmem>>, %arg8: memref<8x1xf32, #tpu.memory_space<vmem>>, %arg9: memref<8x1xf32, #tpu.memory_space<vmem>>) attributes {dimension_semantics = [#tpu.dimension_semantics<parallel>, #tpu.dimension_semantics<arbitrary>], iteration_bounds = array<i64: 1, 3>, scalar_prefetch = 0 : i64, scratch_operands = 5 : i64, tpu.core_type = #tpu.core_type<tc>, window_params = [{transform_indices = @transform_0, window_bounds = array<i64: 8, 512>}, {transform_indices = @transform_1, window_bounds = array<i64: 8, 512>}, {transform_indices = @transform_2, window_bounds = array<i64: 8, 1>}]} {
    %c0_i32 = arith.constant 0 : i32
    %0 = arith.cmpi eq, %arg1, %c0_i32 : i32
    %1 = arith.extui %0 : i1 to i32
    %c0_i32_0 = arith.constant 0 : i32
    %2 = arith.cmpi ne, %1, %c0_i32_0 : i32
    scf.if %2 {
      %cst_29 = arith.constant 0.000000e+00 : f32
      %36 = vector.broadcast %cst_29 : f32 to vector<8x1xf32>
      %c0_30 = arith.constant 0 : index
      %c0_31 = arith.constant 0 : index
      %37 = vector.load %arg5[%c0_30, %c0_31] : memref<8x1xf32, #tpu.memory_space<vmem>>, vector<8x1xf32>
      tpu.vector_store %arg5[%c0_30, %c0_31], %36 {strides = array<i32>} : memref<8x1xf32, #tpu.memory_space<vmem>>, vector<8x1xf32>,
      %cst_32 = arith.constant 0.000000e+00 : f32
      %38 = vector.broadcast %cst_32 : f32 to vector<8x1xf32>
      %c0_33 = arith.constant 0 : index
      %c0_34 = arith.constant 0 : index
      %39 = vector.load %arg6[%c0_33, %c0_34] : memref<8x1xf32, #tpu.memory_space<vmem>>, vector<8x1xf32>
      tpu.vector_store %arg6[%c0_33, %c0_34], %38 {strides = array<i32>} : memref<8x1xf32, #tpu.memory_space<vmem>>, vector<8x1xf32>,
      %cst_35 = arith.constant 0.000000e+00 : f32
      %40 = vector.broadcast %cst_35 : f32 to vector<8x1xf32>
      %c0_36 = arith.constant 0 : index
      %c0_37 = arith.constant 0 : index
      %41 = vector.load %arg7[%c0_36, %c0_37] : memref<8x1xf32, #tpu.memory_space<vmem>>, vector<8x1xf32>
      tpu.vector_store %arg7[%c0_36, %c0_37], %40 {strides = array<i32>} : memref<8x1xf32, #tpu.memory_space<vmem>>, vector<8x1xf32>,
      %cst_38 = arith.constant 0.000000e+00 : f32
      %42 = vector.broadcast %cst_38 : f32 to vector<8x1xf32>
      %c0_39 = arith.constant 0 : index
      %c0_40 = arith.constant 0 : index
      %43 = vector.load %arg8[%c0_39, %c0_40] : memref<8x1xf32, #tpu.memory_space<vmem>>, vector<8x1xf32>
      tpu.vector_store %arg8[%c0_39, %c0_40], %42 {strides = array<i32>} : memref<8x1xf32, #tpu.memory_space<vmem>>, vector<8x1xf32>,
      %cst_41 = arith.constant 0.000000e+00 : f32
      %44 = vector.broadcast %cst_41 : f32 to vector<8x1xf32>
      %c0_42 = arith.constant 0 : index
      %c0_43 = arith.constant 0 : index
      %45 = vector.load %arg9[%c0_42, %c0_43] : memref<8x1xf32, #tpu.memory_space<vmem>>, vector<8x1xf32>
      tpu.vector_store %arg9[%c0_42, %c0_43], %44 {strides = array<i32>} : memref<8x1xf32, #tpu.memory_space<vmem>>, vector<8x1xf32>,
    } else {
    }
    %c0 = arith.constant 0 : index
    %c0_1 = arith.constant 0 : index
    %3 = vector.load %arg2[%c0, %c0_1] : memref<8x512xf32, #tpu.memory_space<vmem>>, vector<8x512xf32>
    %c0_2 = arith.constant 0 : index
    %c0_3 = arith.constant 0 : index
    %4 = vector.load %arg3[%c0_2, %c0_3] : memref<8x512xf32, #tpu.memory_space<vmem>>, vector<8x512xf32>
    %c0_4 = arith.constant 0 : index
    %c0_5 = arith.constant 0 : index
    %5 = vector.load %arg5[%c0_4, %c0_5] : memref<8x1xf32, #tpu.memory_space<vmem>>, vector<8x1xf32>
    %cst = arith.constant dense<0.000000e+00> : vector<8xf32>
    %6 = vector.multi_reduction <add>, %3, %cst [1] : vector<8x512xf32> to vector<8xf32>
    %7 = vector.shape_cast %6 : vector<8xf32> to vector<8x1xf32>
    %8 = arith.addf %5, %7 : vector<8x1xf32>
    %c0_6 = arith.constant 0 : index
    %c0_7 = arith.constant 0 : index
    %9 = vector.load %arg5[%c0_6, %c0_7] : memref<8x1xf32, #tpu.memory_space<vmem>>, vector<8x1xf32>
    tpu.vector_store %arg5[%c0_6, %c0_7], %8 {strides = array<i32>} : memref<8x1xf32, #tpu.memory_space<vmem>>, vector<8x1xf32>,
    %c0_8 = arith.constant 0 : index
    %c0_9 = arith.constant 0 : index
    %10 = vector.load %arg6[%c0_8, %c0_9] : memref<8x1xf32, #tpu.memory_space<vmem>>, vector<8x1xf32>
    %cst_10 = arith.constant dense<0.000000e+00> : vector<8xf32>
    %11 = vector.multi_reduction <add>, %4, %cst_10 [1] : vector<8x512xf32> to vector<8xf32>
    %12 = vector.shape_cast %11 : vector<8xf32> to vector<8x1xf32>
    %13 = arith.addf %10, %12 : vector<8x1xf32>
    %c0_11 = arith.constant 0 : index
    %c0_12 = arith.constant 0 : index
    %14 = vector.load %arg6[%c0_11, %c0_12] : memref<8x1xf32, #tpu.memory_space<vmem>>, vector<8x1xf32>
    tpu.vector_store %arg6[%c0_11, %c0_12], %13 {strides = array<i32>} : memref<8x1xf32, #tpu.memory_space<vmem>>, vector<8x1xf32>,
    %c0_13 = arith.constant 0 : index
    %c0_14 = arith.constant 0 : index
    %15 = vector.load %arg7[%c0_13, %c0_14] : memref<8x1xf32, #tpu.memory_space<vmem>>, vector<8x1xf32>
    %16 = arith.mulf %3, %4 : vector<8x512xf32>
    %cst_15 = arith.constant dense<0.000000e+00> : vector<8xf32>
    %17 = vector.multi_reduction <add>, %16, %cst_15 [1] : vector<8x512xf32> to vector<8xf32>
    %18 = vector.shape_cast %17 : vector<8xf32> to vector<8x1xf32>
    %19 = arith.addf %15, %18 : vector<8x1xf32>
    %c0_16 = arith.constant 0 : index
    %c0_17 = arith.constant 0 : index
    %20 = vector.load %arg7[%c0_16, %c0_17] : memref<8x1xf32, #tpu.memory_space<vmem>>, vector<8x1xf32>
    tpu.vector_store %arg7[%c0_16, %c0_17], %19 {strides = array<i32>} : memref<8x1xf32, #tpu.memory_space<vmem>>, vector<8x1xf32>,
    %c0_18 = arith.constant 0 : index
    %c0_19 = arith.constant 0 : index
    %21 = vector.load %arg8[%c0_18, %c0_19] : memref<8x1xf32, #tpu.memory_space<vmem>>, vector<8x1xf32>
    %22 = arith.mulf %3, %3 : vector<8x512xf32>
    %cst_20 = arith.constant dense<0.000000e+00> : vector<8xf32>
    %23 = vector.multi_reduction <add>, %22, %cst_20 [1] : vector<8x512xf32> to vector<8xf32>
    %24 = vector.shape_cast %23 : vector<8xf32> to vector<8x1xf32>
    %25 = arith.addf %21, %24 : vector<8x1xf32>
    %c0_21 = arith.constant 0 : index
    %c0_22 = arith.constant 0 : index
    %26 = vector.load %arg8[%c0_21, %c0_22] : memref<8x1xf32, #tpu.memory_space<vmem>>, vector<8x1xf32>
    tpu.vector_store %arg8[%c0_21, %c0_22], %25 {strides = array<i32>} : memref<8x1xf32, #tpu.memory_space<vmem>>, vector<8x1xf32>,
    %c0_23 = arith.constant 0 : index
    %c0_24 = arith.constant 0 : index
    %27 = vector.load %arg9[%c0_23, %c0_24] : memref<8x1xf32, #tpu.memory_space<vmem>>, vector<8x1xf32>
    %28 = arith.mulf %4, %4 : vector<8x512xf32>
    %cst_25 = arith.constant dense<0.000000e+00> : vector<8xf32>
    %29 = vector.multi_reduction <add>, %28, %cst_25 [1] : vector<8x512xf32> to vector<8xf32>
    %30 = vector.shape_cast %29 : vector<8xf32> to vector<8x1xf32>
    %31 = arith.addf %27, %30 : vector<8x1xf32>
    %c0_26 = arith.constant 0 : index
    %c0_27 = arith.constant 0 : index
    %32 = vector.load %arg9[%c0_26, %c0_27] : memref<8x1xf32, #tpu.memory_space<vmem>>, vector<8x1xf32>
    tpu.vector_store %arg9[%c0_26, %c0_27], %31 {strides = array<i32>} : memref<8x1xf32, #tpu.memory_space<vmem>>, vector<8x1xf32>,
    %c2_i32 = arith.constant 2 : i32
    %33 = arith.cmpi eq, %arg1, %c2_i32 : i32
    %34 = arith.extui %33 : i1 to i32
    %c0_i32_28 = arith.constant 0 : i32
    %35 = arith.cmpi ne, %34, %c0_i32_28 : i32
    scf.if %35 {
      %c0_29 = arith.constant 0 : index
      %c0_30 = arith.constant 0 : index
      %36 = vector.load %arg5[%c0_29, %c0_30] : memref<8x1xf32, #tpu.memory_space<vmem>>, vector<8x1xf32>
      %c0_31 = arith.constant 0 : index
      %c0_32 = arith.constant 0 : index
      %37 = vector.load %arg6[%c0_31, %c0_32] : memref<8x1xf32, #tpu.memory_space<vmem>>, vector<8x1xf32>
      %c0_33 = arith.constant 0 : index
      %c0_34 = arith.constant 0 : index
      %38 = vector.load %arg7[%c0_33, %c0_34] : memref<8x1xf32, #tpu.memory_space<vmem>>, vector<8x1xf32>
      %c0_35 = arith.constant 0 : index
      %c0_36 = arith.constant 0 : index
      %39 = vector.load %arg8[%c0_35, %c0_36] : memref<8x1xf32, #tpu.memory_space<vmem>>, vector<8x1xf32>
      %c0_37 = arith.constant 0 : index
      %c0_38 = arith.constant 0 : index
      %40 = vector.load %arg9[%c0_37, %c0_38] : memref<8x1xf32, #tpu.memory_space<vmem>>, vector<8x1xf32>
      %cst_39 = arith.constant 1.536000e+03 : f32
      %41 = vector.broadcast %cst_39 : f32 to vector<8x1xf32>
      %42 = arith.mulf %41, %38 : vector<8x1xf32>
      %43 = arith.mulf %36, %37 : vector<8x1xf32>
      %44 = arith.subf %42, %43 : vector<8x1xf32>
      %cst_40 = arith.constant 1.536000e+03 : f32
      %45 = vector.broadcast %cst_40 : f32 to vector<8x1xf32>
      %46 = arith.mulf %45, %39 : vector<8x1xf32>
      %47 = arith.mulf %36, %36 : vector<8x1xf32>
      %48 = arith.subf %46, %47 : vector<8x1xf32>
      %cst_41 = arith.constant 1.536000e+03 : f32
      %49 = vector.broadcast %cst_41 : f32 to vector<8x1xf32>
      %50 = arith.mulf %49, %40 : vector<8x1xf32>
      %51 = arith.mulf %37, %37 : vector<8x1xf32>
      %52 = arith.subf %50, %51 : vector<8x1xf32>
      %53 = arith.mulf %48, %52 : vector<8x1xf32>
      %54 = math.rsqrt %53 : vector<8x1xf32>
      %55 = arith.mulf %44, %54 : vector<8x1xf32>
      %cst_42 = arith.constant 1.000000e+00 : f32
      %56 = vector.broadcast %cst_42 : f32 to vector<8x1xf32>
      %57 = arith.subf %56, %55 : vector<8x1xf32>
      %c0_43 = arith.constant 0 : index
      %c0_44 = arith.constant 0 : index
      %58 = vector.load %arg4[%c0_43, %c0_44] : memref<8x1xf32, #tpu.memory_space<vmem>>, vector<8x1xf32>
      tpu.vector_store %arg4[%c0_43, %c0_44], %57 {strides = array<i32>} : memref<8x1xf32, #tpu.memory_space<vmem>>, vector<8x1xf32>,
    } else {
    }
    return
  }
  func.func @transform_0(%arg0: i32, %arg1: i32) -> (i32, i32) {
    %c0_i32 = arith.constant 0 : i32
    return %arg0, %arg1 : i32, i32
  }
  func.func @transform_1(%arg0: i32, %arg1: i32) -> (i32, i32) {
    %c0_i32 = arith.constant 0 : i32
    return %arg0, %arg1 : i32, i32
  }
  func.func @transform_2(%arg0: i32, %arg1: i32) -> (i32, i32) {
    %c0_i32 = arith.constant 0 : i32
    %c0_i32_0 = arith.constant 0 : i32
    return %arg0, %c0_i32 : i32, i32
  }
}

</mosaic_0001>

<bundles_post_ra>
// kernel: tpu_custom_call.1
= control target key start
LH: loop header
LB: loop body
LE: loop exit
PB: predicated region body
PF: predicated region fallthrough
CT: control target
= control target key end

     0   :  { %7 = vsyncpa [#allocation8], 0  ;;  %s741_s0 = inlined_call_operand.hbm [shape: f32[8,1536], index: 0, kind: input, shape index: {}]   ;;  %s742_s1 = inlined_call_operand.hbm [shape: f32[8,1536], index: 1, kind: input, shape index: {}]   ;;  %s743_s2 = inlined_call_operand.vmem [shape: f32[8,1], index: 2, kind: output, shape index: {}]  }
   0x1   :  { %9 = vsyncpa [#allocation8 + $0x1], 0 }
   0x2   :  { %10 = vsyncpa [#allocation10], 0 }
   0x3   :  { %12 = vsyncpa [#allocation10 + $0x1], 0  ;;  %s640_s9 = smov 0   ;;  %s642_s10 = smov 0  }
   0x4   :  { %s644_s11 = smov 0   ;;  %s646_s12 = smov 0  }
   0x5   :  { %s648_s13 = smov 0   ;;  %s650_s14 = smov 0  }
   0x6 LB: > { %s426_s15 = sadd.s32 4294967295, %s622_s14   ;;  %s27_s16 = sadd.s32 1, %s618_s13  ;;  %s622_s14 = sphi %s650_s14, %s18_s14   ;;  %s618_s13 = sphi %s648_s13, %s750_s13   ;;  %s614_s12 = sphi %s646_s12, %s749_s12   ;;  %s610_s11 = sphi %s644_s11, %s748_s11   ;;  %s606_s10 = sphi %s642_s10, %s747_s10   ;;  %s602_s9 = sphi %s640_s9, %s746_s9  }
   0x7   : > { %p28_p0 = scmp.ge.s32.totalorder %s27_s16, 3  ;;  %s39_s17 = sadd.s32 1, %s610_s11 }
   0x8   : > { %p46_p1 = scmp.ne.s32.totalorder %s610_s11, %s606_s10  ;;  %p47_p2 = scmp.eq.s32.totalorder %s622_s14, 0 }
   0x9   : > { %s752_s16 = smov (%p28_p0, %s27_s16), 0  ;;  %p52_p4 = scmp.ne.s32.totalorder %s606_s10, %s602_s9 }
   0xa   : > { %p676_p3 = por %p47_p2, %p46_p1  ;;  %s35_s19 = ssub.s32 %s618_s13, %s752_s16 }
   0xb   : > { %p53_p5 = scmp.eq.s32.totalorder %s426_s15, 0  ;;  %p37_p6 = scmp.eq.s32.totalorder %s35_s19, 0 }
   0xc   : > { %p456_p8 = scmp.lt.s32.totalorder %s622_s14, 3  ;;  %s130_s22 = sand.u32 1, %s610_s11  }
   0xd   : > { %p683_p7 = por %p53_p5, %p52_p4  ;;  %s443_s23 = sshll.u32 %s618_s13, 5 }
   0xe   : > { %s689_s21 = scalar_select %p37_p6, %s610_s11, %s39_s17  }
   0xf   : > { %s429_s24 = sshll.u32 %s130_s22, 5  ;;  %s141_s27 = scalar_lea.hbm %s741_s0, %s443_s23 }
  0x10   : > { %s143_s28 = sshll.u32 %s141_s27, 4  ;;  %s134_s29 = scalar_lea.vmem [#allocation7], %s429_s24  ;;  %s144_s28 = int_to_ptr.hbm [resolvable:$true] %s143_s28 }
  0x11   : > { %s145_s30 = sshll.u32 %s134_s29, 4  ;;  %p450_p9 = pnand %p456_p8, %p676_p3  ;;  %s146_s30 = int_to_ptr.vmem [resolvable:$true] %s145_s30 }
  0x12   : > { %p435_p10 = scmp.ge.s32.totalorder %s622_s14, 1  ;;  %p172_p11 = scmp.lt.s32.totalorder %s622_s14, 4 }
  0x13   : > { %s131_s3 = scalar_lea.sflag [#allocation8], %s130_s22  ;;  %s163_s6 = scalar_lea.hbm %s742_s1, %s443_s23 }
  0x14   : > { %452 = dma.hbm_to_vmem [thread:$0]  (!%p450_p9), %s144_s28, 512, %s146_s30, %s131_s3  }
  0x15   : > { %p173_p12 = pnand %p435_p10, %p172_p11  ;;  %s165_s7 = sshll.u32 %s163_s6, 4  ;;  %s166_s7 = int_to_ptr.hbm [resolvable:$true] %s165_s7 }
  0x16   : > { %s156_s8 = scalar_lea.vmem [#allocation9], %s429_s24  ;;  %s153_s15 = scalar_lea.sflag [#allocation10], %s130_s22 }
  0x17   : > { %s167_s9 = sshll.u32 %s156_s8, 4  ;;  %176 = sbr.rel (%p173_p12) target bundleno = 217 (0xd9), region = 28  ;;  %s168_s9 = int_to_ptr.vmem [resolvable:$true] %s167_s9 }
  0x18   : > { %455 = dma.hbm_to_vmem [thread:$0]  (!%p450_p9), %s166_s7, 512, %s168_s9, %s153_s15  }
  0x19   : > { %s178_s17 = sand.u32 (!%p173_p12), 1, %s606_s10  }
  0x1a   : > { %s436_s18 = sshll.u32 (!%p173_p12), %s178_s17, 5  ;;  %s179_s19 = scalar_lea.sflag (!%p173_p12), [#allocation8], %s178_s17 }
  0x1b   : > { %s182_s25 = scalar_lea.vmem (!%p173_p12), [#allocation7], %s436_s18 }
  0x1c   : > { %593 = dma.done.wait (%p683_p7), %s179_s19, 512  }
  0x1d   : > { %595 = vsyncadd (%p683_p7), %s179_s19, 4294966784  ;;  %s189_s23 = scalar_lea.sflag [#allocation10], %s178_s17  ;;  %s192_s24 = scalar_lea.vmem [#allocation9], %s436_s18 }
  0x1e   : > { %597 = dma.done.wait (%p683_p7), %s189_s23, 512  }
  0x1f   : > { %599 = vsyncadd (%p683_p7), %s189_s23, 4294966784  ;;  %p438_p13 = scmp.ne.s32.totalorder %s614_s12, 0 }
  0x21   : > { %227 = sbr.rel (%p438_p13) target bundleno = 44 (0x2c), region = 40 }
  0x26   : > { %vm228_vm0 = vcmask 7168   ;;  %v624_v0 = vmov 0.0  }
  0x27   : > { %229 = vst.msk [vmem:[#allocation2] sm:$0xff] %vm228_vm0, %v624_v0 }
  0x28   : > { %230 = vst.msk [vmem:[#allocation3] sm:$0xff] %vm228_vm0, %v624_v0 }
  0x29   : > { %231 = vst.msk [vmem:[#allocation4] sm:$0xff] %vm228_vm0, %v624_v0 }
  0x2a   : > { %232 = vst.msk [vmem:[#allocation5] sm:$0xff] %vm228_vm0, %v624_v0 }
  0x2b   : > { %233 = vst.msk [vmem:[#allocation6] sm:$0xff] %vm228_vm0, %v624_v0 }
  0x2c PF: > { %v234_v1 = vld [vmem:[%s182_s25] sm:$0xff]  ;;  %v235_v2 = vld [vmem:[%s182_s25 + $0x8] sm:$0xff]  ;;  %v236_v3 = vld [vmem:[%s182_s25 + $0x10] sm:$0xff]  ;;  %vm249_vm1 = vcmask 7168   ;;  %p439_p0 = scmp.ne.s32.totalorder %s614_s12, 2 }
  0x2d   : > { %v237_v4 = vld [vmem:[%s182_s25 + $0x18] sm:$0xff]  ;;  %v238_v5 = vld [vmem:[%s192_s24] sm:$0xff]  ;;  %v239_v6 = vld [vmem:[%s192_s24 + $0x8] sm:$0xff]  ;;  %v243_v7 = vadd.f32 %v235_v2, %v234_v1  ;;  %v272_v8 = vmul.f32 %v234_v1, %v234_v1  ;;  %v273_v9 = vmul.f32 %v235_v2, %v235_v2  ;;  %v274_v27 = vmul.f32 %v236_v3, %v236_v3 }
  0x2e   : > { %v240_v10 = vld [vmem:[%s192_s24 + $0x10] sm:$0xff]  ;;  %v241_v11 = vld [vmem:[%s192_s24 + $0x18] sm:$0xff]  ;;  %v260_v12 = vmul.f32 %v238_v5, %v234_v1  ;;  %v261_v13 = vmul.f32 %v239_v6, %v235_v2  ;;  %v284_v14 = vmul.f32 %v238_v5, %v238_v5  ;;  %v285_v15 = vmul.f32 %v239_v6, %v239_v6 }
  0x2f   : > { %v262_v16 = vmul.f32 %v240_v10, %v236_v3  ;;  %v244_v17 = vadd.f32 %v243_v7, %v236_v3  ;;  %v286_v18 = vmul.f32 %v240_v10, %v240_v10  ;;  %v263_v19 = vmul.f32 %v241_v11, %v237_v4  ;;  %v242_v36 = vld [vmem:[#allocation2] sm:$0xff]  ;;  %v251_v45 = vld [vmem:[#allocation3] sm:$0xff] }
  0x30   : > { %v264_v20 = vadd.f32 %v261_v13, %v260_v12  ;;  %v287_v21 = vmul.f32 %v241_v11, %v241_v11  ;;  %v288_v22 = vadd.f32 %v285_v15, %v284_v14  ;;  %v252_v24 = vadd.f32 %v239_v6, %v238_v5  ;;  %v259_v38 = vld [vmem:[#allocation4] sm:$0xff] }
  0x31   : > { %v245_v23 = vadd.f32 %v244_v17, %v237_v4  ;;  %v276_v28 = vadd.f32 %v273_v9, %v272_v8  ;;  %v275_v32 = vmul.f32 %v237_v4, %v237_v4  ;;  %v271_v47 = vld [vmem:[#allocation5] sm:$0xff] }
  0x32   : > { %v265_v25 = vadd.f32 %v264_v20, %v262_v16  ;;  %v289_v26 = vadd.f32 %v288_v22, %v286_v18  ;;  %v253_v29 = vadd.f32 %v252_v24, %v240_v10  ;;  %v283_v40 = vld [vmem:[#allocation6] sm:$0xff] }
  0x33   : > { %246 = vadd.xlane.f32.xlu0 %v245_v23  ;;  %v277_v33 = vadd.f32 %v276_v28, %v274_v27 }
  0x34   : > { %v266_v30 = vadd.f32 %v265_v25, %v263_v19  ;;  %v290_v31 = vadd.f32 %v289_v26, %v287_v21  ;;  %v254_v34 = vadd.f32 %v253_v29, %v241_v11 }
  0x35   : > { %v278_v35 = vadd.f32 %v277_v33, %v275_v32 }
  0x36   : > { %267 = vadd.xlane.f32.xlu1 %v266_v30  ;;  %291 = vadd.xlane.f32.xlu2 %v290_v31 }
  0x3b   : > { %255 = vadd.xlane.f32.xlu0 %v254_v34 }
  0x3e   : > { %279 = vadd.xlane.f32.xlu1 %v278_v35 }
  0xa6   : > { %v247_v37 = vpop.xlane.xlu0 %246 }
  0xa7   : > { %v248_v39 = vadd.f32 %v247_v37, %v242_v36 }
  0xa9   : > { %v268_v41 = vpop.xlane.xlu1 %267  ;;  %250 = vst.msk [vmem:[#allocation2] sm:$0xff] %vm249_vm1, %v248_v39  ;;  %v292_v42 = vpop.xlane.xlu2 %291 }
  0xaa   : > { %v269_v43 = vadd.f32 %v268_v41, %v259_v38  ;;  %v293_v44 = vadd.f32 %v292_v42, %v283_v40 }
  0xac   : > { %270 = vst.msk [vmem:[#allocation4] sm:$0xff] %vm249_vm1, %v269_v43 }
  0xad   : > { %294 = vst.msk [vmem:[#allocation6] sm:$0xff] %vm249_vm1, %v293_v44 }
  0xae   : > { %v256_v46 = vpop.xlane.xlu0 %255 }
  0xaf   : > { %v257_v48 = vadd.f32 %v256_v46, %v251_v45 }
  0xb0   : > { %298 = sbr.rel (%p439_p0) target bundleno = 217 (0xd9), region = 44 }
  0xb1   : > { %v280_v49 = vpop.xlane.xlu1 %279  ;;  %258 = vst.msk [vmem:[#allocation3] sm:$0xff] %vm249_vm1, %v257_v48 }
  0xb2   : > { %v281_v50 = vadd.f32 %v280_v49, %v271_v47 }
  0xb4   : > { %282 = vst.msk [vmem:[#allocation5] sm:$0xff] %vm249_vm1, %v281_v50 }
  0xb5   : > { %v299_v51 = vld [vmem:[#allocation2] sm:$0xff]  ;;  %v301_v63 = vld [vmem:[#allocation4] sm:$0xff] }
  0xb6   : > { %v303_v54 = vld [vmem:[#allocation6] sm:$0xff]  ;;  %v308_v55 = vmul.f32 %v299_v51, %v299_v51  ;;  %v304_v2 = vmul.f32 1536.0, %v301_v63 }
  0xb7   : > { %v310_v58 = vmul.f32 1536.0, %v303_v54 }
  0xb8   : > { %v300_v52 = vld [vmem:[#allocation3] sm:$0xff] }
  0xb9   : > { %v311_v56 = vmul.f32 %v300_v52, %v300_v52  ;;  %v305_v3 = vmul.f32 %v300_v52, %v299_v51 }
  0xbb   : > { %v302_v53 = vld [vmem:[#allocation5] sm:$0xff]  ;;  %v312_v60 = vsub.f32 %v310_v58, %v311_v56  ;;  %v306_v6 = vsub.f32 %v304_v2, %v305_v3 }
  0xbc   : > { %v307_v57 = vmul.f32 1536.0, %v302_v53 }
  0xbe   : > { %v309_v59 = vsub.f32 %v307_v57, %v308_v55 }
  0xc0   : > { %v313_v61 = vmul.f32 %v312_v60, %v309_v59 }
  0xc2   : > { %506 = vrsqrt.f32 %v313_v61  ;;  %vm320_vm2 = vweird.f32 %v313_v61 }
  0xc8   : > { %v507_v62 = vpop.eup %506 }
  0xc9   : > { %v315_v0 = vmul.f32 %v507_v62, %v313_v61  ;;  %vm321_vm3 = vweird.f32 %v507_v62 }
  0xca   : > { %vm322_vm4 = vmor %vm320_vm2, %vm321_vm3 }
  0xcb   : > { %v316_v1 = vmul.f32 %v507_v62, %v315_v0 }
  0xcd   : > { %v317_v4 = vmul.f32 0.5, %v316_v1 }
  0xcf   : > { %v318_v5 = vsub.f32 1.5, %v317_v4 }
  0xd1   : > { %v319_v7 = vmul.f32 %v507_v62, %v318_v5 }
  0xd3   : > { %v323_v8 = vsel %vm322_vm4, %v507_v62, %v319_v7 }
  0xd4   : > { %v324_v9 = vmul.f32 %v323_v8, %v306_v6 }
  0xd6   : > { %v325_v10 = vsub.f32 1.0, %v324_v9 }
  0xd8   : > { %326 = vst.msk [vmem:[%s743_s2] sm:$0xff] %vm249_vm1, %v325_v10 }
  0xd9 PF: > { %s18_s14 = sadd.s32 1, %s622_s14   ;;  %s746_s9 = smov %s606_s10 }
  0xda   : > { %p15_p1 = scmp.ge.s32.totalorder %s18_s14, 5   ;;  %s747_s10 = smov %s610_s11 }
  0xdb   : > { %s748_s11 = smov %s689_s21  ;;  %s749_s12 = smov %s618_s13 }
  0xdc   : > { %s750_s13 = smov %s752_s16  ;;  %17 = sbr.rel (!%p15_p1) target bundleno = 6 (0x6), region = 89 }
  0xe1   :  { %346 = vsyncpa [#allocation8], 1 }
  0xe2   :  { %348 = vsyncpa [#allocation8 + $0x1], 1 }
  0xe3   :  { %349 = vsyncpa [#allocation10], 1 }
  0xe4   :  { %351 = vsyncpa [#allocation10 + $0x1], 1 }

</bundles_post_ra>
